<compile_context>
chip_gen: v5e
topology: v5e:2x2
jax: 0.10.0
libtpu: 0.0.40
codegen_flags: <defaults>
</compile_context>

<pallas_src>
import jax
import jax.numpy as jnp
from jax.experimental import pallas as pl
from jax.experimental.pallas import tpu as pltpu


# -----------------------------------------------------------------------------
# Kernel
# -----------------------------------------------------------------------------
def mlp_kernel(x_ref, w1_ref, b1_ref, w2_ref, b2_ref, w3_ref, b3_ref, o_ref):
    # fc1 + ReLU. x arrives f32 and is cast to bf16 in-kernel (no extra XLA
    # repack pass over x in HBM); all matmuls accumulate in f32 on the MXU.
    x = x_ref[...].astype(jnp.bfloat16)
    h1 = jnp.dot(x, w1_ref[...], preferred_element_type=jnp.float32)
    h1 = jnp.maximum(h1 + b1_ref[...], 0.0)
    # dropout (eval mode) -> identity
    # fc2 + ReLU
    h2 = jnp.dot(h1.astype(jnp.bfloat16), w2_ref[...],
                 preferred_element_type=jnp.float32)
    h2 = jnp.maximum(h2 + b2_ref[...], 0.0)
    # fc3 (logits, lane-padded to a multiple of 128; pad cols of w3/b3 are zero)
    out = jnp.dot(h2.astype(jnp.bfloat16), w3_ref[...],
                  preferred_element_type=jnp.float32)
    o_ref[...] = (out + b3_ref[...]).astype(o_ref.dtype)


# -----------------------------------------------------------------------------
# Helpers
# -----------------------------------------------------------------------------
def _round_up(x, m):
    return ((x + m - 1) // m) * m


def _pick_batch_tile(B):
    """Single grid step unless tiling yields >=4 steps of >=128 rows.

    Large tiles amortize the ~0.35us/step grid overhead and fill the 128/256-row
    MXU; per-row VMEM cost here is <1 KiB, so up to 2048 rows is cheap."""
    for tile in (2048, 1024, 512, 256, 128):
        if B % tile == 0 and B // tile >= 4:
            return tile
    return B


def _vmem_budget_bytes(batch_tile, in_dim, h0, h1, c_pad, weight_buffers):
    """VMEM need: resident weights (x1 if single-buffered), double-buffered x/out
    tiles, plus f32 intermediates."""
    bf16, f32 = 2, 4
    weights = (in_dim * h0 + h0 * h1 + h1 * c_pad) * bf16
    biases = (h0 + h1 + c_pad) * f32
    resident = weight_buffers * (weights + biases)
    io = 2 * (batch_tile * in_dim * f32 + batch_tile * c_pad * bf16)
    temps = batch_tile * (h0 + h1 + c_pad) * f32
    return resident + io + temps


def _vmem_cap_bytes():
    """Device-aware cap for the scoped VMEM limit (~7/8 of physical VMEM)."""
    try:
        cap = pltpu.get_tpu_info().vmem_capacity_bytes
    except Exception:
        cap = 64 * 1024 * 1024  # conservative: v7x per-TensorCore VMEM
    return (cap * 7) // 8


def _make_in_specs(batch_tile, in_dim, h0, h1, c_pad, single_buffer_weights):
    def resident(shape):
        if single_buffer_weights:
            # Constant index_map across the grid -> no need to double-buffer.
            return pl.BlockSpec(shape, lambda i: (0, 0),
                                pipeline_mode=pl.Buffered(1))
        return pl.BlockSpec(shape, lambda i: (0, 0))

    return [
        pl.BlockSpec((batch_tile, in_dim), lambda i: (i, 0)),  # x (tiled, f32)
        resident((in_dim, h0)),                                # w1
        resident((1, h0)),                                     # b1
        resident((h0, h1)),                                    # w2
        resident((1, h1)),                                     # b2
        resident((h1, c_pad)),                                 # w3 (padded)
        resident((1, c_pad)),                                  # b3 (padded)
    ]


# -----------------------------------------------------------------------------
# Parameter packing (one-time, outside the per-call path)
# -----------------------------------------------------------------------------
def pack_params(params):
    """Cast weights to bf16, biases to f32, and lane-pad fc3 to a multiple of
    128 — done ONCE so the per-call wrapper issues no weight-repack HBM traffic."""
    w1, b1, w2, b2, w3, b3 = (params[k] for k in ("w1", "b1", "w2", "b2", "w3", "b3"))
    C = w3.shape[1]
    c_pad = _round_up(C, 128)
    return {
        "w1": w1.astype(jnp.bfloat16),
        "b1": b1.astype(jnp.float32).reshape(1, -1),
        "w2": w2.astype(jnp.bfloat16),
        "b2": b2.astype(jnp.float32).reshape(1, -1),
        "w3": jnp.pad(w3.astype(jnp.bfloat16), ((0, 0), (0, c_pad - C))),
        "b3": jnp.pad(b3.astype(jnp.float32).reshape(1, -1), ((0, 0), (0, c_pad - C))),
        "num_classes": C,
    }


# -----------------------------------------------------------------------------
# Forward wrapper
# -----------------------------------------------------------------------------
def neural_net_forward(x, packed, *, batch_tile=None, out_dtype=jnp.float32):
    """Fused forward pass of NeuralNet (eval mode).

    x:      [B, input_size] float32 (cast to bf16 inside the kernel)
    packed: output of pack_params() (bf16 weights stored [in, out], i.e. W^T,
            f32 biases, fc3 lane-padded).
    """
    w1, b1, w2, b2, w3, b3 = (packed[k] for k in ("w1", "b1", "w2", "b2", "w3", "b3"))
    C = packed["num_classes"]
    B, in_dim = x.shape
    h0 = w1.shape[1]
    h1 = w2.shape[1]
    c_pad = w3.shape[1]

    if batch_tile is None:
        batch_tile = _pick_batch_tile(B)
    assert B % batch_tile == 0, "batch_tile must divide B"
    assert batch_tile == B or batch_tile % 8 == 0, (
        "batch_tile must be a multiple of 8 unless it equals the full batch"
    )

    grid = (B // batch_tile,)
    # Only shard across TensorCores when each step gets a meaningful row count.
    dim_sem = ("parallel",) if grid[0] > 1 else ("arbitrary",)
    out_specs = pl.BlockSpec((batch_tile, c_pad), lambda i: (i, 0))
    vmem_cap = _vmem_cap_bytes()

    def build(single_buffer_weights):
        needed = _vmem_budget_bytes(
            batch_tile, in_dim, h0, h1, c_pad,
            weight_buffers=1 if single_buffer_weights else 2)
        vmem_limit = None
        if needed > 16 * 1024 * 1024:
            vmem_limit = min(int(needed * 1.25), vmem_cap)
        return pl.pallas_call(
            mlp_kernel,
            out_shape=jax.ShapeDtypeStruct((B, c_pad), jnp.bfloat16),
            grid_spec=pl.GridSpec(
                grid=grid,
                in_specs=_make_in_specs(batch_tile, in_dim, h0, h1, c_pad,
                                        single_buffer_weights),
                out_specs=out_specs,
            ),
            compiler_params=pltpu.CompilerParams(
                dimension_semantics=dim_sem,
                vmem_limit_bytes=vmem_limit,
            ),
        )

    try:
        out_padded = build(True)(x, w1, b1, w2, b2, w3, b3)
    except Exception:
        # Fallback if this jax/Mosaic build rejects pipeline_mode=pl.Buffered(1)
        # on the constant-index (resident) weight blocks.
        out_padded = build(False)(x, w1, b1, w2, b2, w3, b3)

    out = out_padded[:, :C] if C != c_pad else out_padded
    return out.astype(out_dtype)


# -----------------------------------------------------------------------------
# Params + reference
# -----------------------------------------------------------------------------
def init_params(key, input_size, hidden_size_list, num_classes):
    """Deterministic parameter init (uniform, matching nn.Linear fan-in scale)."""
    h0, h1 = hidden_size_list
    keys = jax.random.split(key, 6)

    def linear(kw, kb, fan_in, fan_out):
        bound = 1.0 / jnp.sqrt(fan_in)
        # Store weight already transposed: [in, out]
        w = jax.random.uniform(kw, (fan_in, fan_out), jnp.float32, -bound, bound)
        b = jax.random.uniform(kb, (1, fan_out), jnp.float32, -bound, bound)
        return w, b

    w1, b1 = linear(keys[0], keys[1], input_size, h0)
    w2, b2 = linear(keys[2], keys[3], h0, h1)
    w3, b3 = linear(keys[4], keys[5], h1, num_classes)
    return {"w1": w1, "b1": b1, "w2": w2, "b2": b2, "w3": w3, "b3": b3}


def reference_forward(x, params):
    """Pure-JAX reference with the same bf16-weight / f32-accumulate recipe."""
    xb = x.astype(jnp.bfloat16)
    w1 = params["w1"].astype(jnp.bfloat16)
    w2 = params["w2"].astype(jnp.bfloat16)
    w3 = params["w3"].astype(jnp.bfloat16)
    h = jnp.dot(xb, w1, preferred_element_type=jnp.float32) + params["b1"]
    h = jnp.maximum(h, 0.0)
    h = jnp.dot(h.astype(jnp.bfloat16), w2, preferred_element_type=jnp.float32) + params["b2"]
    h = jnp.maximum(h, 0.0)
    return jnp.dot(h.astype(jnp.bfloat16), w3, preferred_element_type=jnp.float32) + params["b3"]


# -----------------------------------------------------------------------------
# Main
# -----------------------------------------------------------------------------
if __name__ == "__main__":
    input_size = 32
    hidden_size_list = [64, 32]
    num_classes = 10
    batch = 64  # small batch -> single grid step, one TensorCore, no step overhead

    key = jax.random.PRNGKey(0)
    kx, kp = jax.random.split(key)
    x = jax.random.normal(kx, (batch, input_size), jnp.float32)
    params = init_params(kp, input_size, hidden_size_list, num_classes)
    packed = pack_params(params)  # one-time bf16 cast + lane padding

    out = neural_net_forward(x, packed)
    out = jax.block_until_ready(out)

    ref = reference_forward(x, params)
    assert out.shape == (batch, num_classes)
    assert jnp.allclose(out, ref, atol=2e-2, rtol=2e-2), "mismatch vs reference"

    print("KERNEL_OK")
</pallas_src>

<mosaic_0001>
module attributes {stable_mosaic.version = 11 : i64} {
  func.func @mlp_kernel(%arg0: i32, %arg1: memref<64x32xf32, #tpu.memory_space<vmem>>, %arg2: memref<32x64xbf16, #tpu.memory_space<vmem>>, %arg3: memref<1x64xf32, #tpu.memory_space<vmem>>, %arg4: memref<64x32xbf16, #tpu.memory_space<vmem>>, %arg5: memref<1x32xf32, #tpu.memory_space<vmem>>, %arg6: memref<32x128xbf16, #tpu.memory_space<vmem>>, %arg7: memref<1x128xf32, #tpu.memory_space<vmem>>, %arg8: memref<64x128xbf16, #tpu.memory_space<vmem>>) attributes {dimension_semantics = [#tpu.dimension_semantics<arbitrary>], iteration_bounds = array<i64: 1>, scalar_prefetch = 0 : i64, scratch_operands = 0 : i64, tpu.core_type = #tpu.core_type<tc>, window_params = [{transform_indices = @transform_0, window_bounds = array<i64: 64, 32>}, {pipeline_mode = #tpu.pipeline_mode<synchronous>, transform_indices = @transform_1, window_bounds = array<i64: 32, 64>}, {pipeline_mode = #tpu.pipeline_mode<synchronous>, transform_indices = @transform_2, window_bounds = array<i64: 1, 64>}, {pipeline_mode = #tpu.pipeline_mode<synchronous>, transform_indices = @transform_3, window_bounds = array<i64: 64, 32>}, {pipeline_mode = #tpu.pipeline_mode<synchronous>, transform_indices = @transform_4, window_bounds = array<i64: 1, 32>}, {pipeline_mode = #tpu.pipeline_mode<synchronous>, transform_indices = @transform_5, window_bounds = array<i64: 32, 128>}, {pipeline_mode = #tpu.pipeline_mode<synchronous>, transform_indices = @transform_6, window_bounds = array<i64: 1, 128>}, {transform_indices = @transform_7, window_bounds = array<i64: 64, 128>}]} {
    %c0 = arith.constant 0 : index
    %c0_0 = arith.constant 0 : index
    %0 = vector.load %arg1[%c0, %c0_0] : memref<64x32xf32, #tpu.memory_space<vmem>>, vector<64x32xf32>
    %1 = arith.truncf %0 : vector<64x32xf32> to vector<64x32xbf16>
    %c0_1 = arith.constant 0 : index
    %c0_2 = arith.constant 0 : index
    %2 = vector.load %arg2[%c0_1, %c0_2] : memref<32x64xbf16, #tpu.memory_space<vmem>>, vector<32x64xbf16>
    %cst = arith.constant dense<0.000000e+00> : vector<64x64xf32>
    %3 = tpu.matmul %1, %2, %cst {dimension_numbers = #tpu.dot_dimension_numbers<[1], [0], [0], [1], [0, 0, 1, 1], [], []>} : vector<64x32xbf16>, vector<32x64xbf16>, vector<64x64xf32> -> vector<64x64xf32>
    %c0_3 = arith.constant 0 : index
    %c0_4 = arith.constant 0 : index
    %4 = vector.load %arg3[%c0_3, %c0_4] : memref<1x64xf32, #tpu.memory_space<vmem>>, vector<1x64xf32>
    %5 = vector.broadcast %4 : vector<1x64xf32> to vector<64x64xf32>
    %6 = arith.addf %3, %5 : vector<64x64xf32>
    %cst_5 = arith.constant 0.000000e+00 : f32
    %7 = vector.broadcast %cst_5 : f32 to vector<64x64xf32>
    %8 = arith.maximumf %6, %7 : vector<64x64xf32>
    %9 = arith.truncf %8 : vector<64x64xf32> to vector<64x64xbf16>
    %c0_6 = arith.constant 0 : index
    %c0_7 = arith.constant 0 : index
    %10 = vector.load %arg4[%c0_6, %c0_7] : memref<64x32xbf16, #tpu.memory_space<vmem>>, vector<64x32xbf16>
    %cst_8 = arith.constant dense<0.000000e+00> : vector<64x32xf32>
    %11 = tpu.matmul %9, %10, %cst_8 {dimension_numbers = #tpu.dot_dimension_numbers<[1], [0], [0], [1], [0, 0, 1, 1], [], []>} : vector<64x64xbf16>, vector<64x32xbf16>, vector<64x32xf32> -> vector<64x32xf32>
    %c0_9 = arith.constant 0 : index
    %c0_10 = arith.constant 0 : index
    %12 = vector.load %arg5[%c0_9, %c0_10] : memref<1x32xf32, #tpu.memory_space<vmem>>, vector<1x32xf32>
    %13 = vector.broadcast %12 : vector<1x32xf32> to vector<64x32xf32>
    %14 = arith.addf %11, %13 : vector<64x32xf32>
    %cst_11 = arith.constant 0.000000e+00 : f32
    %15 = vector.broadcast %cst_11 : f32 to vector<64x32xf32>
    %16 = arith.maximumf %14, %15 : vector<64x32xf32>
    %17 = arith.truncf %16 : vector<64x32xf32> to vector<64x32xbf16>
    %c0_12 = arith.constant 0 : index
    %c0_13 = arith.constant 0 : index
    %18 = vector.load %arg6[%c0_12, %c0_13] : memref<32x128xbf16, #tpu.memory_space<vmem>>, vector<32x128xbf16>
    %cst_14 = arith.constant dense<0.000000e+00> : vector<64x128xf32>
    %19 = tpu.matmul %17, %18, %cst_14 {dimension_numbers = #tpu.dot_dimension_numbers<[1], [0], [0], [1], [0, 0, 1, 1], [], []>} : vector<64x32xbf16>, vector<32x128xbf16>, vector<64x128xf32> -> vector<64x128xf32>
    %c0_15 = arith.constant 0 : index
    %c0_16 = arith.constant 0 : index
    %20 = vector.load %arg7[%c0_15, %c0_16] : memref<1x128xf32, #tpu.memory_space<vmem>>, vector<1x128xf32>
    %21 = vector.broadcast %20 : vector<1x128xf32> to vector<64x128xf32>
    %22 = arith.addf %19, %21 : vector<64x128xf32>
    %23 = arith.truncf %22 : vector<64x128xf32> to vector<64x128xbf16>
    %c0_17 = arith.constant 0 : index
    %c0_18 = arith.constant 0 : index
    %24 = vector.load %arg8[%c0_17, %c0_18] : memref<64x128xbf16, #tpu.memory_space<vmem>>, vector<64x128xbf16>
    tpu.vector_store %arg8[%c0_17, %c0_18], %23 {strides = array<i32>} : memref<64x128xbf16, #tpu.memory_space<vmem>>, vector<64x128xbf16>,
    return
  }
  func.func @transform_0(%arg0: i32) -> (i32, i32) {
    %c0_i32 = arith.constant 0 : i32
    %c0_i32_0 = arith.constant 0 : i32
    return %arg0, %c0_i32 : i32, i32
  }
  func.func @transform_1(%arg0: i32) -> (i32, i32) {
    %c0_i32 = arith.constant 0 : i32
    %c0_i32_0 = arith.constant 0 : i32
    %c0_i32_1 = arith.constant 0 : i32
    return %c0_i32, %c0_i32_0 : i32, i32
  }
  func.func @transform_2(%arg0: i32) -> (i32, i32) {
    %c0_i32 = arith.constant 0 : i32
    %c0_i32_0 = arith.constant 0 : i32
    %c0_i32_1 = arith.constant 0 : i32
    return %c0_i32, %c0_i32_0 : i32, i32
  }
  func.func @transform_3(%arg0: i32) -> (i32, i32) {
    %c0_i32 = arith.constant 0 : i32
    %c0_i32_0 = arith.constant 0 : i32
    %c0_i32_1 = arith.constant 0 : i32
    return %c0_i32, %c0_i32_0 : i32, i32
  }
  func.func @transform_4(%arg0: i32) -> (i32, i32) {
    %c0_i32 = arith.constant 0 : i32
    %c0_i32_0 = arith.constant 0 : i32
    %c0_i32_1 = arith.constant 0 : i32
    return %c0_i32, %c0_i32_0 : i32, i32
  }
  func.func @transform_5(%arg0: i32) -> (i32, i32) {
    %c0_i32 = arith.constant 0 : i32
    %c0_i32_0 = arith.constant 0 : i32
    %c0_i32_1 = arith.constant 0 : i32
    return %c0_i32, %c0_i32_0 : i32, i32
  }
  func.func @transform_6(%arg0: i32) -> (i32, i32) {
    %c0_i32 = arith.constant 0 : i32
    %c0_i32_0 = arith.constant 0 : i32
    %c0_i32_1 = arith.constant 0 : i32
    return %c0_i32, %c0_i32_0 : i32, i32
  }
  func.func @transform_7(%arg0: i32) -> (i32, i32) {
    %c0_i32 = arith.constant 0 : i32
    %c0_i32_0 = arith.constant 0 : i32
    return %arg0, %c0_i32 : i32, i32
  }
}

module attributes {stable_mosaic.version = 11 : i64} {
  func.func @mlp_kernel(%arg0: i32, %arg1: memref<64x32xf32, #tpu.memory_space<vmem>>, %arg2: memref<32x64xbf16, #tpu.memory_space<vmem>>, %arg3: memref<1x64xf32, #tpu.memory_space<vmem>>, %arg4: memref<64x32xbf16, #tpu.memory_space<vmem>>, %arg5: memref<1x32xf32, #tpu.memory_space<vmem>>, %arg6: memref<32x128xbf16, #tpu.memory_space<vmem>>, %arg7: memref<1x128xf32, #tpu.memory_space<vmem>>, %arg8: memref<64x128xbf16, #tpu.memory_space<vmem>>) attributes {dimension_semantics = [#tpu.dimension_semantics<arbitrary>], iteration_bounds = array<i64: 1>, scalar_prefetch = 0 : i64, scratch_operands = 0 : i64, tpu.core_type = #tpu.core_type<tc>, window_params = [{transform_indices = @transform_0, window_bounds = array<i64: 64, 32>}, {pipeline_mode = #tpu.pipeline_mode<synchronous>, transform_indices = @transform_1, window_bounds = array<i64: 32, 64>}, {pipeline_mode = #tpu.pipeline_mode<synchronous>, transform_indices = @transform_2, window_bounds = array<i64: 1, 64>}, {pipeline_mode = #tpu.pipeline_mode<synchronous>, transform_indices = @transform_3, window_bounds = array<i64: 64, 32>}, {pipeline_mode = #tpu.pipeline_mode<synchronous>, transform_indices = @transform_4, window_bounds = array<i64: 1, 32>}, {pipeline_mode = #tpu.pipeline_mode<synchronous>, transform_indices = @transform_5, window_bounds = array<i64: 32, 128>}, {pipeline_mode = #tpu.pipeline_mode<synchronous>, transform_indices = @transform_6, window_bounds = array<i64: 1, 128>}, {transform_indices = @transform_7, window_bounds = array<i64: 64, 128>}]} {
    %c0 = arith.constant 0 : index
    %c0_0 = arith.constant 0 : index
    %0 = vector.load %arg1[%c0, %c0_0] : memref<64x32xf32, #tpu.memory_space<vmem>>, vector<64x32xf32>
    %1 = arith.truncf %0 : vector<64x32xf32> to vector<64x32xbf16>
    %c0_1 = arith.constant 0 : index
    %c0_2 = arith.constant 0 : index
    %2 = vector.load %arg2[%c0_1, %c0_2] : memref<32x64xbf16, #tpu.memory_space<vmem>>, vector<32x64xbf16>
    %cst = arith.constant dense<0.000000e+00> : vector<64x64xf32>
    %3 = tpu.matmul %1, %2, %cst {dimension_numbers = #tpu.dot_dimension_numbers<[1], [0], [0], [1], [0, 0, 1, 1], [], []>} : vector<64x32xbf16>, vector<32x64xbf16>, vector<64x64xf32> -> vector<64x64xf32>
    %c0_3 = arith.constant 0 : index
    %c0_4 = arith.constant 0 : index
    %4 = vector.load %arg3[%c0_3, %c0_4] : memref<1x64xf32, #tpu.memory_space<vmem>>, vector<1x64xf32>
    %5 = vector.broadcast %4 : vector<1x64xf32> to vector<64x64xf32>
    %6 = arith.addf %3, %5 : vector<64x64xf32>
    %cst_5 = arith.constant 0.000000e+00 : f32
    %7 = vector.broadcast %cst_5 : f32 to vector<64x64xf32>
    %8 = arith.maximumf %6, %7 : vector<64x64xf32>
    %9 = arith.truncf %8 : vector<64x64xf32> to vector<64x64xbf16>
    %c0_6 = arith.constant 0 : index
    %c0_7 = arith.constant 0 : index
    %10 = vector.load %arg4[%c0_6, %c0_7] : memref<64x32xbf16, #tpu.memory_space<vmem>>, vector<64x32xbf16>
    %cst_8 = arith.constant dense<0.000000e+00> : vector<64x32xf32>
    %11 = tpu.matmul %9, %10, %cst_8 {dimension_numbers = #tpu.dot_dimension_numbers<[1], [0], [0], [1], [0, 0, 1, 1], [], []>} : vector<64x64xbf16>, vector<64x32xbf16>, vector<64x32xf32> -> vector<64x32xf32>
    %c0_9 = arith.constant 0 : index
    %c0_10 = arith.constant 0 : index
    %12 = vector.load %arg5[%c0_9, %c0_10] : memref<1x32xf32, #tpu.memory_space<vmem>>, vector<1x32xf32>
    %13 = vector.broadcast %12 : vector<1x32xf32> to vector<64x32xf32>
    %14 = arith.addf %11, %13 : vector<64x32xf32>
    %cst_11 = arith.constant 0.000000e+00 : f32
    %15 = vector.broadcast %cst_11 : f32 to vector<64x32xf32>
    %16 = arith.maximumf %14, %15 : vector<64x32xf32>
    %17 = arith.truncf %16 : vector<64x32xf32> to vector<64x32xbf16>
    %c0_12 = arith.constant 0 : index
    %c0_13 = arith.constant 0 : index
    %18 = vector.load %arg6[%c0_12, %c0_13] : memref<32x128xbf16, #tpu.memory_space<vmem>>, vector<32x128xbf16>
    %cst_14 = arith.constant dense<0.000000e+00> : vector<64x128xf32>
    %19 = tpu.matmul %17, %18, %cst_14 {dimension_numbers = #tpu.dot_dimension_numbers<[1], [0], [0], [1], [0, 0, 1, 1], [], []>} : vector<64x32xbf16>, vector<32x128xbf16>, vector<64x128xf32> -> vector<64x128xf32>
    %c0_15 = arith.constant 0 : index
    %c0_16 = arith.constant 0 : index
    %20 = vector.load %arg7[%c0_15, %c0_16] : memref<1x128xf32, #tpu.memory_space<vmem>>, vector<1x128xf32>
    %21 = vector.broadcast %20 : vector<1x128xf32> to vector<64x128xf32>
    %22 = arith.addf %19, %21 : vector<64x128xf32>
    %23 = arith.truncf %22 : vector<64x128xf32> to vector<64x128xbf16>
    %c0_17 = arith.constant 0 : index
    %c0_18 = arith.constant 0 : index
    %24 = vector.load %arg8[%c0_17, %c0_18] : memref<64x128xbf16, #tpu.memory_space<vmem>>, vector<64x128xbf16>
    tpu.vector_store %arg8[%c0_17, %c0_18], %23 {strides = array<i32>} : memref<64x128xbf16, #tpu.memory_space<vmem>>, vector<64x128xbf16>,
    return
  }
  func.func @transform_0(%arg0: i32) -> (i32, i32) {
    %c0_i32 = arith.constant 0 : i32
    %c0_i32_0 = arith.constant 0 : i32
    return %arg0, %c0_i32 : i32, i32
  }
  func.func @transform_1(%arg0: i32) -> (i32, i32) {
    %c0_i32 = arith.constant 0 : i32
    %c0_i32_0 = arith.constant 0 : i32
    %c0_i32_1 = arith.constant 0 : i32
    return %c0_i32, %c0_i32_0 : i32, i32
  }
  func.func @transform_2(%arg0: i32) -> (i32, i32) {
    %c0_i32 = arith.constant 0 : i32
    %c0_i32_0 = arith.constant 0 : i32
    %c0_i32_1 = arith.constant 0 : i32
    return %c0_i32, %c0_i32_0 : i32, i32
  }
  func.func @transform_3(%arg0: i32) -> (i32, i32) {
    %c0_i32 = arith.constant 0 : i32
    %c0_i32_0 = arith.constant 0 : i32
    %c0_i32_1 = arith.constant 0 : i32
    return %c0_i32, %c0_i32_0 : i32, i32
  }
  func.func @transform_4(%arg0: i32) -> (i32, i32) {
    %c0_i32 = arith.constant 0 : i32
    %c0_i32_0 = arith.constant 0 : i32
    %c0_i32_1 = arith.constant 0 : i32
    return %c0_i32, %c0_i32_0 : i32, i32
  }
  func.func @transform_5(%arg0: i32) -> (i32, i32) {
    %c0_i32 = arith.constant 0 : i32
    %c0_i32_0 = arith.constant 0 : i32
    %c0_i32_1 = arith.constant 0 : i32
    return %c0_i32, %c0_i32_0 : i32, i32
  }
  func.func @transform_6(%arg0: i32) -> (i32, i32) {
    %c0_i32 = arith.constant 0 : i32
    %c0_i32_0 = arith.constant 0 : i32
    %c0_i32_1 = arith.constant 0 : i32
    return %c0_i32, %c0_i32_0 : i32, i32
  }
  func.func @transform_7(%arg0: i32) -> (i32, i32) {
    %c0_i32 = arith.constant 0 : i32
    %c0_i32_0 = arith.constant 0 : i32
    return %arg0, %c0_i32 : i32, i32
  }
}

</mosaic_0001>

<bundles_post_ra>
// kernel: tpu_custom_call.1
= control target key start
LH: loop header
LB: loop body
LE: loop exit
PB: predicated region body
PF: predicated region fallthrough
CT: control target
= control target key end

     0   :  { %s525_s0 = inlined_call_operand.vmem [shape: f32[64,32], index: 0, kind: input, shape index: {}]   ;;  %s526_s1 = inlined_call_operand.vmem [shape: bf16[32,64], index: 1, kind: input, shape index: {}]   ;;  %s527_s2 = inlined_call_operand.vmem [shape: f32[1,64], index: 2, kind: input, shape index: {}]   ;;  %s528_s3 = inlined_call_operand.vmem [shape: bf16[64,32], index: 3, kind: input, shape index: {}]   ;;  %s529_s4 = inlined_call_operand.vmem [shape: f32[1,32], index: 4, kind: input, shape index: {}]   ;;  %s530_s5 = inlined_call_operand.vmem [shape: bf16[32,128], index: 5, kind: input, shape index: {}]   ;;  %s531_s6 = inlined_call_operand.vmem [shape: f32[1,128], index: 6, kind: input, shape index: {}]   ;;  %s532_s7 = inlined_call_operand.hbm [shape: bf16[64,128], index: 7, kind: output, shape index: {}]  }
   0x1   :  { %v344_v0 = vld [vmem:[%s526_s1 + $0x8] sm:$0xff]  ;;  %v343_v1 = vld [vmem:[%s526_s1] sm:$0xff] }
   0x2   :  { %79 = vmatpush.bf16.msra.mxu0 %v344_v0  ;;  %v28_v2 = vld [vmem:[%s525_s0] sm:$0xff]  ;;  %v29_v3 = vld [vmem:[%s525_s0 + $0x8] sm:$0xff] }
   0x3   :  { %12 = vsyncpa [#allocation3], 0  ;;  %v36_v4 = vpack.c.bf16 %v29_v3, %v28_v2  ;;  %vm60_vm0 = vcmask 261120   ;;  %v30_v5 = vld [vmem:[%s525_s0 + $0x10] sm:$0xff]  ;;  %v31_v6 = vld [vmem:[%s525_s0 + $0x18] sm:$0xff]  ;;  %vm150_vm1 = vcmask 523264  }
   0x4   :  { %v37_v7 = vpack.c.bf16 %v31_v6, %v30_v5  ;;  %v32_v8 = vld [vmem:[%s525_s0 + $0x20] sm:$0xff]  ;;  %v33_v9 = vld [vmem:[%s525_s0 + $0x28] sm:$0xff]  ;;  %v34_v11 = vld [vmem:[%s525_s0 + $0x30] sm:$0xff]  ;;  %s410_s10 = smov [#allocation2]   ;;  %s287_s12 = sshll.u32 %s532_s7, 4  ;;  %s288_s12 = int_to_ptr.hbm [resolvable:$true] %s287_s12 }
   0x5   :  { %v38_v10 = vpack.c.bf16 %v33_v9, %v32_v8  ;;  %v35_v12 = vld [vmem:[%s525_s0 + $0x38] sm:$0xff]  ;;  %v347_v15 = vld [vmem:[%s528_s3 + $0x10] sm:$0xff]  ;;  %v346_v16 = vld [vmem:[%s528_s3 + $0x8] sm:$0xff]  ;;  %s411_s13 = smov 64   ;;  %s412_s14 = smov 4  }
   0x6   :  { %80 = vmatpush.bf16.msra.mxu0 %v343_v1  ;;  %v39_v13 = vpack.c.bf16 %v35_v12, %v34_v11  ;;  %v348_v14 = vld [vmem:[%s528_s3 + $0x18] sm:$0xff]  ;;  %v345_v17 = vld [vmem:[%s528_s3] sm:$0xff]  ;;  %v350_v47 = vld [vmem:[%s530_s5 + $0x8] sm:$0xff] }
   0x7   :  { %167 = vmatpush.bf16.msra.mxu1 %v348_v14  ;;  %374 = vmatpush.bf16.msra.mxu3 %v348_v14  ;;  %v381_v19 = vld [vmem:[%s527_s2] ss:$0 sm:$0xff] }
   0x8   :  { %242 = vmatpush.bf16.msra.mxu2 %v350_v47  ;;  %v349_v48 = vld [vmem:[%s530_s5] sm:$0xff] }
   0x9   :  { %307 = vmatmul.msk.bf16.vlgmr.msra.gmra.mxu0 %vm60_vm0, %v36_v4  ;;  %v382_v50 = vld [vmem:[%s529_s4] ss:$0 sm:$0xff] }
   0xb   :  { %168 = vmatpush.bf16.msra.mxu1 %v347_v15  ;;  %375 = vmatpush.bf16.msra.mxu3 %v347_v15  ;;  %v383_v15 = vld [vmem:[%s531_s6] ss:$0 sm:$0xff]  ;;  %s285_s6 = sshll.u32 %s410_s10, 4  ;;  %s286_s6 = int_to_ptr.vmem [resolvable:$true] %s285_s6 }
   0xc   :  { %243 = vmatpush.bf16.msra.mxu2 %v349_v48 }
   0xf   :  { %169 = vmatpush.bf16.msra.mxu1 %v346_v16  ;;  %376 = vmatpush.bf16.msra.mxu3 %v346_v16 }
  0x13   :  { %170 = vmatpush.bf16.msra.mxu1 %v345_v17  ;;  %377 = vmatpush.bf16.msra.mxu3 %v345_v17 }
  0x19   :  { %308 = vmatmul.msk.bf16.gmra.mxu0 %vm60_vm0, %v37_v7 }
  0x29   :  { %309 = vmatmul.msk.bf16.gmra.mxu0 %vm60_vm0, %v38_v10 }
  0x39   :  { %310 = vmatmul.msk.bf16.gmra.mxu0 %vm60_vm0, %v39_v13 }
  0x86   :  { %v82_v18 = vpop.f32.mrf.mxu0 }
  0x87   :  { %v83_v20 = vadd.f32 %v381_v19, %v82_v18 }
  0x89   :  { %v102_v23 = vmax.f32 %v83_v20, 0.0 }
  0x8e   :  { %v84_v21 = vpop.f32.mrf.mxu0 }
  0x8f   :  { %v85_v22 = vadd.f32 %v381_v19, %v84_v21 }
  0x91   :  { %v103_v24 = vmax.f32 %v85_v22, 0.0 }
  0x93   :  { %v110_v25 = vpack.c.bf16 %v103_v24, %v102_v23 }
  0x95   :  { %327 = vmatmul.msk.bf16.vlgmr.msra.gmra.mxu1 %vm150_vm1, %v110_v25 }
  0x96   :  { %v87_v26 = vpop.f32.mrf.mxu0 }
  0x97   :  { %v88_v27 = vadd.f32 %v381_v19, %v87_v26 }
  0x99   :  { %v104_v30 = vmax.f32 %v88_v27, 0.0 }
  0x9e   :  { %v89_v28 = vpop.f32.mrf.mxu0 }
  0x9f   :  { %v90_v29 = vadd.f32 %v381_v19, %v89_v28 }
  0xa1   :  { %v105_v31 = vmax.f32 %v90_v29, 0.0 }
  0xa3   :  { %v111_v32 = vpack.c.bf16 %v105_v31, %v104_v30 }
  0xa5   :  { %328 = vmatmul.msk.bf16.vlgmr.msra.gmra.mxu3 %vm150_vm1, %v111_v32 }
  0xa6   :  { %v92_v33 = vpop.f32.mrf.mxu0 }
  0xa7   :  { %v93_v34 = vadd.f32 %v381_v19, %v92_v33 }
  0xa9   :  { %v106_v37 = vmax.f32 %v93_v34, 0.0 }
  0xae   :  { %v94_v35 = vpop.f32.mrf.mxu0 }
  0xaf   :  { %v95_v36 = vadd.f32 %v381_v19, %v94_v35 }
  0xb1   :  { %v107_v38 = vmax.f32 %v95_v36, 0.0 }
  0xb3   :  { %v112_v39 = vpack.c.bf16 %v107_v38, %v106_v37 }
  0xb5   :  { %329 = vmatmul.msk.bf16.gmra.mxu3 %vm150_vm1, %v112_v39 }
  0xb6   :  { %v97_v40 = vpop.f32.mrf.mxu0 }
  0xb7   :  { %v98_v41 = vadd.f32 %v381_v19, %v97_v40 }
  0xb9   :  { %v108_v44 = vmax.f32 %v98_v41, 0.0 }
  0xbe   :  { %v99_v42 = vpop.f32.mrf.mxu0 }
  0xbf   :  { %v100_v43 = vadd.f32 %v381_v19, %v99_v42 }
  0xc1   :  { %v109_v45 = vmax.f32 %v100_v43, 0.0 }
  0xc3   :  { %v113_v46 = vpack.c.bf16 %v109_v45, %v108_v44 }
  0xc5   :  { %330 = vmatmul.msk.bf16.gmra.mxu3 %vm150_vm1, %v113_v46 }
 0x112   :  { %v172_v49 = vpop.f32.mrf.mxu1 }
 0x113   :  { %v173_v51 = vadd.f32 %v382_v50, %v172_v49 }
 0x115   :  { %v192_v54 = vmax.f32 %v173_v51, 0.0 }
 0x11a   :  { %v174_v52 = vpop.f32.mrf.mxu1 }
 0x11b   :  { %v175_v53 = vadd.f32 %v382_v50, %v174_v52 }
 0x11d   :  { %v193_v55 = vmax.f32 %v175_v53, 0.0 }
 0x11f   :  { %v200_v56 = vpack.c.bf16 %v193_v55, %v192_v54 }
 0x121   :  { %339 = vmatmul.msk.bf16.vlgmr.msra.gmra.mxu2 %vm60_vm0, %v200_v56 }
 0x128   :  { %v177_v57 = vpop.f32.mrf.mxu3 }
 0x129   :  { %v178_v58 = vadd.f32 %v382_v50, %v177_v57 }
 0x12b   :  { %v194_v61 = vmax.f32 %v178_v58, 0.0 }
 0x130   :  { %v179_v59 = vpop.f32.mrf.mxu3 }
 0x131   :  { %v180_v60 = vadd.f32 %v382_v50, %v179_v59 }
 0x133   :  { %v195_v62 = vmax.f32 %v180_v60, 0.0 }
 0x135   :  { %v201_v63 = vpack.c.bf16 %v195_v62, %v194_v61 }
 0x137   :  { %340 = vmatmul.msk.bf16.gmra.mxu2 %vm60_vm0, %v201_v63 }
 0x138   :  { %v182_v0 = vpop.f32.mrf.mxu3 }
 0x139   :  { %v183_v1 = vadd.f32 %v382_v50, %v182_v0 }
 0x13b   :  { %v196_v4 = vmax.f32 %v183_v1, 0.0 }
 0x140   :  { %v184_v2 = vpop.f32.mrf.mxu3 }
 0x141   :  { %v185_v3 = vadd.f32 %v382_v50, %v184_v2 }
 0x143   :  { %v197_v5 = vmax.f32 %v185_v3, 0.0 }
 0x145   :  { %v202_v6 = vpack.c.bf16 %v197_v5, %v196_v4 }
 0x147   :  { %341 = vmatmul.msk.bf16.gmra.mxu2 %vm60_vm0, %v202_v6 }
 0x148   :  { %v187_v7 = vpop.f32.mrf.mxu3 }
 0x149   :  { %v188_v8 = vadd.f32 %v382_v50, %v187_v7 }
 0x14b   :  { %v198_v11 = vmax.f32 %v188_v8, 0.0 }
 0x150   :  { %v189_v9 = vpop.f32.mrf.mxu3 }
 0x151   :  { %v190_v10 = vadd.f32 %v382_v50, %v189_v9 }
 0x153   :  { %v199_v12 = vmax.f32 %v190_v10, 0.0 }
 0x155   :  { %v203_v13 = vpack.c.bf16 %v199_v12, %v198_v11 }
 0x157   :  { %342 = vmatmul.msk.bf16.gmra.mxu2 %vm60_vm0, %v203_v13 }
 0x1a4   :  { %v245_v14 = vpop.f32.mrf.mxu2 }
 0x1a5   :  { %v246_v17 = vadd.f32 %v383_v15, %v245_v14 }
 0x1ac   :  { %v247_v16 = vpop.f32.mrf.mxu2 }
 0x1ad   :  { %v248_v18 = vadd.f32 %v383_v15, %v247_v16 }
 0x1af   :  { %v354_v19 = vpack.c.bf16 %v248_v18, %v246_v17 }
 0x1b1   :  { %355 = vst [vmem:[#allocation2] sm:$0xff] %v354_v19  }
 0x1ba   :  { %v250_v20 = vpop.f32.mrf.mxu2 }
 0x1bb   :  { %v251_v22 = vadd.f32 %v383_v15, %v250_v20 }
 0x1c2   :  { %v252_v21 = vpop.f32.mrf.mxu2 }
 0x1c3   :  { %v253_v23 = vadd.f32 %v383_v15, %v252_v21 }
 0x1c5   :  { %v359_v24 = vpack.c.bf16 %v253_v23, %v251_v22 }
 0x1c7   :  { %371 = vst [vmem:[#allocation2 + $0x8] sm:$0xff] %v359_v24  }
 0x1ca   :  { %v255_v25 = vpop.f32.mrf.mxu2 }
 0x1cb   :  { %v256_v27 = vadd.f32 %v383_v15, %v255_v25 }
 0x1d2   :  { %v257_v26 = vpop.f32.mrf.mxu2 }
 0x1d3   :  { %v258_v28 = vadd.f32 %v383_v15, %v257_v26 }
 0x1d5   :  { %v364_v29 = vpack.c.bf16 %v258_v28, %v256_v27 }
 0x1d7   :  { %372 = vst [vmem:[#allocation2 + $0x10] sm:$0xff] %v364_v29  }
 0x1da   :  { %v260_v30 = vpop.f32.mrf.mxu2 }
 0x1db   :  { %v261_v32 = vadd.f32 %v383_v15, %v260_v30 }
 0x1e2   :  { %v262_v31 = vpop.f32.mrf.mxu2 }
 0x1e3   :  { %v263_v33 = vadd.f32 %v383_v15, %v262_v31 }
 0x1e5   :  { %v369_v34 = vpack.c.bf16 %v263_v33, %v261_v32 }
 0x1e7   :  { %373 = vst [vmem:[#allocation2 + $0x18] sm:$0xff] %v369_v34  }
 0x1e8   :  { %293 = dma.vmem_to_hbm [thread:$0]  %s286_s6, 512, %s288_s12, [#allocation3], %s411_s13, %s411_s13, %s412_s14  }
 0x1e9   :  { %408 = dma.done.wait [#allocation3], 512  }
 0x1ea   :  { %409 = vsyncadd [#allocation3], 4294966784 }
 0x1eb   :  { %298 = vsyncpa [#allocation3], 1 }

// kernel: tpu_custom_call.1
= control target key start
LH: loop header
LB: loop body
LE: loop exit
PB: predicated region body
PF: predicated region fallthrough
CT: control target
= control target key end

     0   :  { %s525_s0 = inlined_call_operand.vmem [shape: f32[64,32], index: 0, kind: input, shape index: {}]   ;;  %s526_s1 = inlined_call_operand.vmem [shape: bf16[32,64], index: 1, kind: input, shape index: {}]   ;;  %s527_s2 = inlined_call_operand.vmem [shape: f32[1,64], index: 2, kind: input, shape index: {}]   ;;  %s528_s3 = inlined_call_operand.vmem [shape: bf16[64,32], index: 3, kind: input, shape index: {}]   ;;  %s529_s4 = inlined_call_operand.vmem [shape: f32[1,32], index: 4, kind: input, shape index: {}]   ;;  %s530_s5 = inlined_call_operand.vmem [shape: bf16[32,128], index: 5, kind: input, shape index: {}]   ;;  %s531_s6 = inlined_call_operand.vmem [shape: f32[1,128], index: 6, kind: input, shape index: {}]   ;;  %s532_s7 = inlined_call_operand.hbm [shape: bf16[64,128], index: 7, kind: output, shape index: {}]  }
   0x1   :  { %v344_v0 = vld [vmem:[%s526_s1 + $0x8] sm:$0xff]  ;;  %v343_v1 = vld [vmem:[%s526_s1] sm:$0xff] }
   0x2   :  { %79 = vmatpush.bf16.msra.mxu0 %v344_v0  ;;  %v28_v2 = vld [vmem:[%s525_s0] sm:$0xff]  ;;  %v29_v3 = vld [vmem:[%s525_s0 + $0x8] sm:$0xff] }
   0x3   :  { %12 = vsyncpa [#allocation3], 0  ;;  %v36_v4 = vpack.c.bf16 %v29_v3, %v28_v2  ;;  %vm60_vm0 = vcmask 261120   ;;  %v30_v5 = vld [vmem:[%s525_s0 + $0x10] sm:$0xff]  ;;  %v31_v6 = vld [vmem:[%s525_s0 + $0x18] sm:$0xff]  ;;  %vm150_vm1 = vcmask 523264  }
   0x4   :  { %v37_v7 = vpack.c.bf16 %v31_v6, %v30_v5  ;;  %v32_v8 = vld [vmem:[%s525_s0 + $0x20] sm:$0xff]  ;;  %v33_v9 = vld [vmem:[%s525_s0 + $0x28] sm:$0xff]  ;;  %v34_v11 = vld [vmem:[%s525_s0 + $0x30] sm:$0xff]  ;;  %s410_s10 = smov [#allocation2]   ;;  %s287_s12 = sshll.u32 %s532_s7, 4  ;;  %s288_s12 = int_to_ptr.hbm [resolvable:$true] %s287_s12 }
   0x5   :  { %v38_v10 = vpack.c.bf16 %v33_v9, %v32_v8  ;;  %v35_v12 = vld [vmem:[%s525_s0 + $0x38] sm:$0xff]  ;;  %v347_v15 = vld [vmem:[%s528_s3 + $0x10] sm:$0xff]  ;;  %v346_v16 = vld [vmem:[%s528_s3 + $0x8] sm:$0xff]  ;;  %s411_s13 = smov 64   ;;  %s412_s14 = smov 4  }
   0x6   :  { %80 = vmatpush.bf16.msra.mxu0 %v343_v1  ;;  %v39_v13 = vpack.c.bf16 %v35_v12, %v34_v11  ;;  %v348_v14 = vld [vmem:[%s528_s3 + $0x18] sm:$0xff]  ;;  %v345_v17 = vld [vmem:[%s528_s3] sm:$0xff]  ;;  %v350_v47 = vld [vmem:[%s530_s5 + $0x8] sm:$0xff] }
   0x7   :  { %167 = vmatpush.bf16.msra.mxu1 %v348_v14  ;;  %374 = vmatpush.bf16.msra.mxu3 %v348_v14  ;;  %v381_v19 = vld [vmem:[%s527_s2] ss:$0 sm:$0xff] }
   0x8   :  { %242 = vmatpush.bf16.msra.mxu2 %v350_v47  ;;  %v349_v48 = vld [vmem:[%s530_s5] sm:$0xff] }
   0x9   :  { %307 = vmatmul.msk.bf16.vlgmr.msra.gmra.mxu0 %vm60_vm0, %v36_v4  ;;  %v382_v50 = vld [vmem:[%s529_s4] ss:$0 sm:$0xff] }
   0xb   :  { %168 = vmatpush.bf16.msra.mxu1 %v347_v15  ;;  %375 = vmatpush.bf16.msra.mxu3 %v347_v15  ;;  %v383_v15 = vld [vmem:[%s531_s6] ss:$0 sm:$0xff]  ;;  %s285_s6 = sshll.u32 %s410_s10, 4  ;;  %s286_s6 = int_to_ptr.vmem [resolvable:$true] %s285_s6 }
   0xc   :  { %243 = vmatpush.bf16.msra.mxu2 %v349_v48 }
   0xf   :  { %169 = vmatpush.bf16.msra.mxu1 %v346_v16  ;;  %376 = vmatpush.bf16.msra.mxu3 %v346_v16 }
  0x13   :  { %170 = vmatpush.bf16.msra.mxu1 %v345_v17  ;;  %377 = vmatpush.bf16.msra.mxu3 %v345_v17 }
  0x19   :  { %308 = vmatmul.msk.bf16.gmra.mxu0 %vm60_vm0, %v37_v7 }
  0x29   :  { %309 = vmatmul.msk.bf16.gmra.mxu0 %vm60_vm0, %v38_v10 }
  0x39   :  { %310 = vmatmul.msk.bf16.gmra.mxu0 %vm60_vm0, %v39_v13 }
  0x86   :  { %v82_v18 = vpop.f32.mrf.mxu0 }
  0x87   :  { %v83_v20 = vadd.f32 %v381_v19, %v82_v18 }
  0x89   :  { %v102_v23 = vmax.f32 %v83_v20, 0.0 }
  0x8e   :  { %v84_v21 = vpop.f32.mrf.mxu0 }
  0x8f   :  { %v85_v22 = vadd.f32 %v381_v19, %v84_v21 }
  0x91   :  { %v103_v24 = vmax.f32 %v85_v22, 0.0 }
  0x93   :  { %v110_v25 = vpack.c.bf16 %v103_v24, %v102_v23 }
  0x95   :  { %327 = vmatmul.msk.bf16.vlgmr.msra.gmra.mxu1 %vm150_vm1, %v110_v25 }
  0x96   :  { %v87_v26 = vpop.f32.mrf.mxu0 }
  0x97   :  { %v88_v27 = vadd.f32 %v381_v19, %v87_v26 }
  0x99   :  { %v104_v30 = vmax.f32 %v88_v27, 0.0 }
  0x9e   :  { %v89_v28 = vpop.f32.mrf.mxu0 }
  0x9f   :  { %v90_v29 = vadd.f32 %v381_v19, %v89_v28 }
  0xa1   :  { %v105_v31 = vmax.f32 %v90_v29, 0.0 }
  0xa3   :  { %v111_v32 = vpack.c.bf16 %v105_v31, %v104_v30 }
  0xa5   :  { %328 = vmatmul.msk.bf16.vlgmr.msra.gmra.mxu3 %vm150_vm1, %v111_v32 }
  0xa6   :  { %v92_v33 = vpop.f32.mrf.mxu0 }
  0xa7   :  { %v93_v34 = vadd.f32 %v381_v19, %v92_v33 }
  0xa9   :  { %v106_v37 = vmax.f32 %v93_v34, 0.0 }
  0xae   :  { %v94_v35 = vpop.f32.mrf.mxu0 }
  0xaf   :  { %v95_v36 = vadd.f32 %v381_v19, %v94_v35 }
  0xb1   :  { %v107_v38 = vmax.f32 %v95_v36, 0.0 }
  0xb3   :  { %v112_v39 = vpack.c.bf16 %v107_v38, %v106_v37 }
  0xb5   :  { %329 = vmatmul.msk.bf16.gmra.mxu3 %vm150_vm1, %v112_v39 }
  0xb6   :  { %v97_v40 = vpop.f32.mrf.mxu0 }
  0xb7   :  { %v98_v41 = vadd.f32 %v381_v19, %v97_v40 }
  0xb9   :  { %v108_v44 = vmax.f32 %v98_v41, 0.0 }
  0xbe   :  { %v99_v42 = vpop.f32.mrf.mxu0 }
  0xbf   :  { %v100_v43 = vadd.f32 %v381_v19, %v99_v42 }
  0xc1   :  { %v109_v45 = vmax.f32 %v100_v43, 0.0 }
  0xc3   :  { %v113_v46 = vpack.c.bf16 %v109_v45, %v108_v44 }
  0xc5   :  { %330 = vmatmul.msk.bf16.gmra.mxu3 %vm150_vm1, %v113_v46 }
 0x112   :  { %v172_v49 = vpop.f32.mrf.mxu1 }
 0x113   :  { %v173_v51 = vadd.f32 %v382_v50, %v172_v49 }
 0x115   :  { %v192_v54 = vmax.f32 %v173_v51, 0.0 }
 0x11a   :  { %v174_v52 = vpop.f32.mrf.mxu1 }
 0x11b   :  { %v175_v53 = vadd.f32 %v382_v50, %v174_v52 }
 0x11d   :  { %v193_v55 = vmax.f32 %v175_v53, 0.0 }
 0x11f   :  { %v200_v56 = vpack.c.bf16 %v193_v55, %v192_v54 }
 0x121   :  { %339 = vmatmul.msk.bf16.vlgmr.msra.gmra.mxu2 %vm60_vm0, %v200_v56 }
 0x128   :  { %v177_v57 = vpop.f32.mrf.mxu3 }
 0x129   :  { %v178_v58 = vadd.f32 %v382_v50, %v177_v57 }
 0x12b   :  { %v194_v61 = vmax.f32 %v178_v58, 0.0 }
 0x130   :  { %v179_v59 = vpop.f32.mrf.mxu3 }
 0x131   :  { %v180_v60 = vadd.f32 %v382_v50, %v179_v59 }
 0x133   :  { %v195_v62 = vmax.f32 %v180_v60, 0.0 }
 0x135   :  { %v201_v63 = vpack.c.bf16 %v195_v62, %v194_v61 }
 0x137   :  { %340 = vmatmul.msk.bf16.gmra.mxu2 %vm60_vm0, %v201_v63 }
 0x138   :  { %v182_v0 = vpop.f32.mrf.mxu3 }
 0x139   :  { %v183_v1 = vadd.f32 %v382_v50, %v182_v0 }
 0x13b   :  { %v196_v4 = vmax.f32 %v183_v1, 0.0 }
 0x140   :  { %v184_v2 = vpop.f32.mrf.mxu3 }
 0x141   :  { %v185_v3 = vadd.f32 %v382_v50, %v184_v2 }
 0x143   :  { %v197_v5 = vmax.f32 %v185_v3, 0.0 }
 0x145   :  { %v202_v6 = vpack.c.bf16 %v197_v5, %v196_v4 }
 0x147   :  { %341 = vmatmul.msk.bf16.gmra.mxu2 %vm60_vm0, %v202_v6 }
 0x148   :  { %v187_v7 = vpop.f32.mrf.mxu3 }
 0x149   :  { %v188_v8 = vadd.f32 %v382_v50, %v187_v7 }
 0x14b   :  { %v198_v11 = vmax.f32 %v188_v8, 0.0 }
 0x150   :  { %v189_v9 = vpop.f32.mrf.mxu3 }
 0x151   :  { %v190_v10 = vadd.f32 %v382_v50, %v189_v9 }
 0x153   :  { %v199_v12 = vmax.f32 %v190_v10, 0.0 }
 0x155   :  { %v203_v13 = vpack.c.bf16 %v199_v12, %v198_v11 }
 0x157   :  { %342 = vmatmul.msk.bf16.gmra.mxu2 %vm60_vm0, %v203_v13 }
 0x1a4   :  { %v245_v14 = vpop.f32.mrf.mxu2 }
 0x1a5   :  { %v246_v17 = vadd.f32 %v383_v15, %v245_v14 }
 0x1ac   :  { %v247_v16 = vpop.f32.mrf.mxu2 }
 0x1ad   :  { %v248_v18 = vadd.f32 %v383_v15, %v247_v16 }
 0x1af   :  { %v354_v19 = vpack.c.bf16 %v248_v18, %v246_v17 }
 0x1b1   :  { %355 = vst [vmem:[#allocation2] sm:$0xff] %v354_v19  }
 0x1ba   :  { %v250_v20 = vpop.f32.mrf.mxu2 }
 0x1bb   :  { %v251_v22 = vadd.f32 %v383_v15, %v250_v20 }
 0x1c2   :  { %v252_v21 = vpop.f32.mrf.mxu2 }
 0x1c3   :  { %v253_v23 = vadd.f32 %v383_v15, %v252_v21 }
 0x1c5   :  { %v359_v24 = vpack.c.bf16 %v253_v23, %v251_v22 }
 0x1c7   :  { %371 = vst [vmem:[#allocation2 + $0x8] sm:$0xff] %v359_v24  }
 0x1ca   :  { %v255_v25 = vpop.f32.mrf.mxu2 }
 0x1cb   :  { %v256_v27 = vadd.f32 %v383_v15, %v255_v25 }
 0x1d2   :  { %v257_v26 = vpop.f32.mrf.mxu2 }
 0x1d3   :  { %v258_v28 = vadd.f32 %v383_v15, %v257_v26 }
 0x1d5   :  { %v364_v29 = vpack.c.bf16 %v258_v28, %v256_v27 }
 0x1d7   :  { %372 = vst [vmem:[#allocation2 + $0x10] sm:$0xff] %v364_v29  }
 0x1da   :  { %v260_v30 = vpop.f32.mrf.mxu2 }
 0x1db   :  { %v261_v32 = vadd.f32 %v383_v15, %v260_v30 }
 0x1e2   :  { %v262_v31 = vpop.f32.mrf.mxu2 }
 0x1e3   :  { %v263_v33 = vadd.f32 %v383_v15, %v262_v31 }
 0x1e5   :  { %v369_v34 = vpack.c.bf16 %v263_v33, %v261_v32 }
 0x1e7   :  { %373 = vst [vmem:[#allocation2 + $0x18] sm:$0xff] %v369_v34  }
 0x1e8   :  { %293 = dma.vmem_to_hbm [thread:$0]  %s286_s6, 512, %s288_s12, [#allocation3], %s411_s13, %s411_s13, %s412_s14  }
 0x1e9   :  { %408 = dma.done.wait [#allocation3], 512  }
 0x1ea   :  { %409 = vsyncadd [#allocation3], 4294966784 }
 0x1eb   :  { %298 = vsyncpa [#allocation3], 1 }

</bundles_post_ra>
